<compile_context>
chip_gen: v7x
topology: tpu7x:2x2x1
jax: 0.10.0
libtpu: 0.0.40
codegen_flags: <defaults>
</compile_context>

<pallas_src>
import jax
import jax.numpy as jnp
from jax.experimental import pallas as pl
from jax.experimental.pallas import tpu as pltpu


N_PAD = 128          # lane-dense resident weight/bias width (>= 10, one full vreg)
TILE_B_MAX = 2048    # batch rows per grid step (safe on v5e/v6e/v7x with 32 MiB scoped VMEM)


def _round_up(n, m):
    return ((n + m - 1) // m) * m


def _choose_tile_b(B, tile_b_max):
    tile_b = min(tile_b_max, _round_up(B, 8))
    # Guarantee >= 2 grid steps when possible so the "parallel" batch axis can
    # shard across both TensorCores on v7x (harmless elsewhere).
    if pl.cdiv(B, tile_b) < 2 and tile_b > 8:
        tile_b = max(8, _round_up(tile_b // 2, 8))
    return tile_b


def linear_kernel(x_ref, wt_ref, b_ref, o_ref):
    # x_ref: (tile_b, 784) input dtype, wt_ref: (784, 128) bf16,
    # b_ref: (1, 128) f32, o_ref: (tile_b, 10) f32.
    n_out = o_ref.shape[-1]
    x = x_ref[...].astype(jnp.bfloat16)                 # VPU cast, hidden under the x DMA
    acc = jnp.dot(x, wt_ref[...], preferred_element_type=jnp.float32)   # MXU, f32 accumulate
    o_ref[...] = (acc + b_ref[...])[:, :n_out].astype(o_ref.dtype)      # narrow masked store


def prepare_params(weight, bias):
    """Hoisted out of the per-call path: transpose + zero-pad + bf16 cast, once.

    weight: (10, 784) float32 (PyTorch nn.Linear layout: out_features x in_features)
    bias:   (10,)     float32
    returns (wt_padded (784,128) bf16, bias_padded (1,128) f32, n_out)
    """
    n_out, k = weight.shape
    wt_padded = (jnp.zeros((k, N_PAD), jnp.bfloat16)
                 .at[:, :n_out].set(weight.T.astype(jnp.bfloat16)))
    bias_padded = (jnp.zeros((1, N_PAD), jnp.float32)
                   .at[:, :n_out].set(bias.astype(jnp.float32)))
    return wt_padded, bias_padded, n_out


def softmax_regression_forward(x, wt_padded, bias_padded, n_out, *, tile_b_max=TILE_B_MAX):
    """Forward pass: logits = flatten(x) @ weight.T + bias  ->  (B, n_out) float32."""
    B = x.shape[0]
    x_flat = x.reshape(B, -1)              # x.view(B, -1); free, no dtype cast in the wrapper
    K = x_flat.shape[1]                    # 784

    tile_b = _choose_tile_b(B, tile_b_max)
    grid = (pl.cdiv(B, tile_b),)           # ragged last block handled by Pallas, no jnp.pad

    return pl.pallas_call(
        linear_kernel,
        out_shape=jax.ShapeDtypeStruct((B, n_out), jnp.float32),
        grid=grid,
        in_specs=[
            pl.BlockSpec((tile_b, K), lambda i: (i, 0)),      # x streams per grid step
            pl.BlockSpec((K, N_PAD), lambda i: (0, 0)),       # bf16 weight, VMEM-resident
            pl.BlockSpec((1, N_PAD), lambda i: (0, 0)),       # bias, VMEM-resident
        ],
        out_specs=pl.BlockSpec((tile_b, n_out), lambda i: (i, 0)),   # narrow (B,10) writeback
        compiler_params=pltpu.CompilerParams(
            dimension_semantics=("parallel",),                # megacore sharding on v7x
            vmem_limit_bytes=32 * 1024 * 1024,                # covers tile_b=2048 on v5e too
        ),
    )(x_flat, wt_padded, bias_padded)


def init_params(key):
    # Deterministic init mimicking nn.Linear default: U(-1/sqrt(fan_in), 1/sqrt(fan_in))
    k_w, k_b = jax.random.split(key)
    fan_in = 28 * 28
    bound = 1.0 / jnp.sqrt(jnp.float32(fan_in))
    weight = jax.random.uniform(k_w, (10, fan_in), jnp.float32, -bound, bound)
    bias = jax.random.uniform(k_b, (10,), jnp.float32, -bound, bound)
    return weight, bias


if __name__ == "__main__":
    key = jax.random.PRNGKey(0)
    k_x, k_p = jax.random.split(key)

    weight, bias = init_params(k_p)
    wt_padded, bias_padded, n_out = prepare_params(weight, bias)   # once, at init

    # Small, module-consistent shape: batch=8 MNIST-sized images.
    B = 8
    x = jax.random.normal(k_x, (B, 28, 28), jnp.float32)

    logits = softmax_regression_forward(x, wt_padded, bias_padded, n_out)
    jax.block_until_ready(logits)

    ref = x.reshape(B, -1) @ weight.T + bias
    assert logits.shape == (B, 10)
    # bf16 MXU inputs with f32 accumulation over K=784 -> loosened tolerance.
    assert jnp.allclose(logits, ref, atol=3e-2, rtol=3e-2)

    # Also exercise the ragged-last-block / multi-grid-step path (no jnp.pad of x).
    B2 = 13
    x2 = jax.random.normal(jax.random.PRNGKey(1), (B2, 28, 28), jnp.float32)
    logits2 = softmax_regression_forward(x2, wt_padded, bias_padded, n_out)
    jax.block_until_ready(logits2)
    ref2 = x2.reshape(B2, -1) @ weight.T + bias
    assert logits2.shape == (B2, 10)
    assert jnp.allclose(logits2, ref2, atol=3e-2, rtol=3e-2)

    print("KERNEL_OK")
</pallas_src>

<mosaic_0001>
module attributes {stable_mosaic.version = 11 : i64} {
  func.func @linear_kernel(%arg0: i32, %arg1: memref<8x784xf32, #tpu.memory_space<vmem>>, %arg2: memref<784x128xbf16, #tpu.memory_space<vmem>>, %arg3: memref<1x128xf32, #tpu.memory_space<vmem>>, %arg4: memref<8x10xf32, #tpu.memory_space<vmem>>) attributes {dimension_semantics = [#tpu.dimension_semantics<parallel>], iteration_bounds = array<i64: 1>, scalar_prefetch = 0 : i64, scratch_operands = 0 : i64, tpu.core_type = #tpu.core_type<tc>, window_params = [{transform_indices = @transform_0, window_bounds = array<i64: 8, 784>}, {pipeline_mode = #tpu.pipeline_mode<synchronous>, transform_indices = @transform_1, window_bounds = array<i64: 784, 128>}, {pipeline_mode = #tpu.pipeline_mode<synchronous>, transform_indices = @transform_2, window_bounds = array<i64: 1, 128>}, {transform_indices = @transform_3, window_bounds = array<i64: 8, 10>}]} {
    %c0 = arith.constant 0 : index
    %c0_0 = arith.constant 0 : index
    %0 = vector.load %arg1[%c0, %c0_0] : memref<8x784xf32, #tpu.memory_space<vmem>>, vector<8x784xf32>
    %1 = arith.truncf %0 : vector<8x784xf32> to vector<8x784xbf16>
    %c0_1 = arith.constant 0 : index
    %c0_2 = arith.constant 0 : index
    %2 = vector.load %arg2[%c0_1, %c0_2] : memref<784x128xbf16, #tpu.memory_space<vmem>>, vector<784x128xbf16>
    %cst = arith.constant dense<0.000000e+00> : vector<8x128xf32>
    %3 = tpu.matmul %1, %2, %cst {dimension_numbers = #tpu.dot_dimension_numbers<[1], [0], [0], [1], [0, 0, 1, 1], [], []>} : vector<8x784xbf16>, vector<784x128xbf16>, vector<8x128xf32> -> vector<8x128xf32>
    %c0_3 = arith.constant 0 : index
    %c0_4 = arith.constant 0 : index
    %4 = vector.load %arg3[%c0_3, %c0_4] : memref<1x128xf32, #tpu.memory_space<vmem>>, vector<1x128xf32>
    %5 = vector.broadcast %4 : vector<1x128xf32> to vector<8x128xf32>
    %6 = arith.addf %3, %5 : vector<8x128xf32>
    %7 = vector.extract_strided_slice %6 {offsets = [0, 0], sizes = [8, 10], strides = [1, 1]} : vector<8x128xf32> to vector<8x10xf32>
    %c0_5 = arith.constant 0 : index
    %c0_6 = arith.constant 0 : index
    %8 = vector.load %arg4[%c0_5, %c0_6] : memref<8x10xf32, #tpu.memory_space<vmem>>, vector<8x10xf32>
    tpu.vector_store %arg4[%c0_5, %c0_6], %7 {strides = array<i32>} : memref<8x10xf32, #tpu.memory_space<vmem>>, vector<8x10xf32>,
    return
  }
  func.func @transform_0(%arg0: i32) -> (i32, i32) {
    %c0_i32 = arith.constant 0 : i32
    %c0_i32_0 = arith.constant 0 : i32
    return %arg0, %c0_i32 : i32, i32
  }
  func.func @transform_1(%arg0: i32) -> (i32, i32) {
    %c0_i32 = arith.constant 0 : i32
    %c0_i32_0 = arith.constant 0 : i32
    %c0_i32_1 = arith.constant 0 : i32
    return %c0_i32, %c0_i32_0 : i32, i32
  }
  func.func @transform_2(%arg0: i32) -> (i32, i32) {
    %c0_i32 = arith.constant 0 : i32
    %c0_i32_0 = arith.constant 0 : i32
    %c0_i32_1 = arith.constant 0 : i32
    return %c0_i32, %c0_i32_0 : i32, i32
  }
  func.func @transform_3(%arg0: i32) -> (i32, i32) {
    %c0_i32 = arith.constant 0 : i32
    %c0_i32_0 = arith.constant 0 : i32
    return %arg0, %c0_i32 : i32, i32
  }
}

</mosaic_0001>

<bundles_post_ra>
// kernel: tpu_custom_call.1
= control target key start
LH: loop header
LB: loop body
LE: loop exit
PB: predicated region body
PF: predicated region fallthrough
CT: control target
= control target key end

     0   :  { %8 = vsyncpa [#allocation3], 0  ;;  %s963_s0 = inlined_call_operand.hbm [shape: f32[8,784], index: 0, kind: input, shape index: {}]   ;;  %s964_s1 = inlined_call_operand.hbm [shape: bf16[784,128], index: 1, kind: input, shape index: {}]   ;;  %s965_s2 = inlined_call_operand.vmem [shape: f32[1,128], index: 2, kind: input, shape index: {}]   ;;  %s966_s3 = inlined_call_operand.hbm [shape: f32[8,10], index: 3, kind: output, shape index: {}]  }
   0x1   :  { %9 = vsyncpa [#allocation6], 0 }
   0x2   :  { %10 = vsyncpa [#allocation4], 0  ;;  %s890_s12 = smov [#allocation2]   ;;  %s891_s14 = smov [#allocation5]  }
   0x3   :  { %s17_s13 = sshll.u32 %s890_s12, 4  ;;  %s26_s15 = sshll.u32 %s891_s14, 4  ;;  %s18_s13 = int_to_ptr.vmem [resolvable:$true] %s17_s13  ;;  %s917_s15 = int_to_ptr.vmem [resolvable:$true] %s26_s15 }
   0x4   :  { %s818_s18 = scalar_lea.hbm %s963_s0, 896 }
   0x5   :  { %p819_p0 = scmp.ne.s32.totalorder %s963_s0, %s818_s18  ;;  %p822_p1 = scmp.lt.u32.totalorder %s818_s18, %s963_s0 }
   0x7   :  { %p824_p2 = pnand %p822_p1, %p819_p0 }
   0x9   :  { %827 = shalt.err (!%p824_p2)
}
   0xa   :  { %s828_s23 = scalar_lea.vmem %s18_s13, 896  ;;  %p833_p4 = scmp.lt.s32.totalorder %s18_s13, %s18_s13 }
   0xb   :  { %p829_p3 = scmp.ne.s32.totalorder %s18_s13, %s828_s23  ;;  %p834_p5 = scmp.lt.s32.totalorder %s828_s23, %s828_s23 }
   0xd   :  { %p835_p6 = por %p834_p5, %p833_p4 }
   0xf   :  { %p836_p7 = pnand %p835_p6, %p829_p3 }
  0x11   :  { %839 = shalt.err (!%p836_p7)
}
  0x12   :  { %20 = dma.hbm_to_vmem [thread:$0]  %s963_s0, 896, %s18_s13, [#allocation3]  }
  0x13   :  { %s840_s28 = scalar_lea.hbm %s964_s1, 6272 }
  0x14   :  { %p841_p8 = scmp.ne.s32.totalorder %s964_s1, %s840_s28  ;;  %p844_p9 = scmp.lt.u32.totalorder %s840_s28, %s964_s1 }
  0x16   :  { %p846_p10 = pnand %p844_p9, %p841_p8 }
  0x18   :  { %849 = shalt.err (!%p846_p10)
}
  0x19   :  { %s850_s6 = scalar_lea.vmem %s917_s15, 6272  ;;  %p855_p12 = scmp.lt.s32.totalorder %s917_s15, %s917_s15 }
  0x1a   :  { %p851_p11 = scmp.ne.s32.totalorder %s917_s15, %s850_s6  ;;  %p856_p13 = scmp.lt.s32.totalorder %s850_s6, %s850_s6 }
  0x1c   :  { %p857_p0 = por %p856_p13, %p855_p12 }
  0x1e   :  { %p858_p1 = pnand %p857_p0, %p851_p11 }
  0x20   :  { %861 = shalt.err (!%p858_p1)
}
  0x21   :  { %s892_s0 = smov 64   ;;  %s893_s7 = smov 4  }
  0x22   :  { %32 = dma.hbm_to_vmem [thread:$0]  %s964_s1, 6272, %s917_s15, [#allocation6], %s892_s0, %s892_s0, %s893_s7  }
  0x23   :  { %884 = dma.done.wait [#allocation3], 896  }
  0x24   :  { %885 = vsyncadd [#allocation3], 4294966400 }
  0x25   :  { %886 = dma.done.wait [#allocation6], 6272  }
  0x26   :  { %887 = vsyncadd [#allocation6], 4294961024  ;;  %v769_v0 = vld [vmem:[#allocation5 + $0x40] sm:$0xff]   ;;  %v773_v4 = vld [vmem:[#allocation5 + $0x48] sm:$0xff]   ;;  %v894_v44 = vmov 0.0   ;;  %vm895_vm0 = vmmov 0  }
  0x27   :  { %v770_v1 = vld [vmem:[#allocation5] sm:$0xff]   ;;  %688 = vmatprep.subr.bf16.mxu0 %v769_v0  ;;  %v774_v5 = vld [vmem:[#allocation5 + $0x8] sm:$0xff]   ;;  %v777_v8 = vld [vmem:[#allocation5 + $0x50] sm:$0xff]   ;;  %vm455_vm1 = vcmask 130048   ;;  %vm619_vm2 = vcmask 80896  }
  0x28   :  { %v771_v2 = vld [vmem:[#allocation5 + $0xc0] sm:$0xff]   ;;  %689 = vmatpush3.bf16.msra.mxu0 %v770_v1  ;;  %v775_v6 = vld [vmem:[#allocation5 + $0xc8] sm:$0xff]   ;;  %v778_v9 = vld [vmem:[#allocation5 + $0x10] sm:$0xff]  }
  0x29   :  { %v772_v3 = vld [vmem:[#allocation5 + $0x80] sm:$0xff]   ;;  %710 = vmatprep.subr.bf16.mxu1 %v771_v2  ;;  %690 = vmatprep.subr.bf16.mxu0 %v773_v4  ;;  %v776_v7 = vld [vmem:[#allocation5 + $0x88] sm:$0xff]   ;;  %v779_v10 = vld [vmem:[#allocation5 + $0xd0] sm:$0xff]  }
  0x2a   :  { %711 = vmatpush3.bf16.msra.mxu1 %v772_v3  ;;  %v780_v11 = vld [vmem:[#allocation5 + $0x90] sm:$0xff]   ;;  %v781_v12 = vld [vmem:[#allocation5 + $0x58] sm:$0xff]   ;;  %v785_v16 = vld [vmem:[#allocation5 + $0x60] sm:$0xff]  }
  0x2b   :  { %712 = vmatprep.subr.bf16.mxu1 %v775_v6  ;;  %v782_v13 = vld [vmem:[#allocation5 + $0x18] sm:$0xff]   ;;  %v786_v17 = vld [vmem:[#allocation5 + $0x20] sm:$0xff]   ;;  %v789_v20 = vld [vmem:[#allocation5 + $0x68] sm:$0xff]  }
  0x2c   :  { %691 = vmatpush3.bf16.msra.mxu0 %v774_v5  ;;  %v783_v14 = vld [vmem:[#allocation5 + $0xd8] sm:$0xff]   ;;  %v787_v18 = vld [vmem:[#allocation5 + $0xe0] sm:$0xff]   ;;  %v790_v21 = vld [vmem:[#allocation5 + $0x28] sm:$0xff]  }
  0x2d   :  { %692 = vmatprep.subr.bf16.mxu0 %v777_v8  ;;  %v784_v15 = vld [vmem:[#allocation5 + $0x98] sm:$0xff]   ;;  %v788_v19 = vld [vmem:[#allocation5 + $0xa0] sm:$0xff]   ;;  %v791_v22 = vld [vmem:[#allocation5 + $0xe8] sm:$0xff]  }
  0x2e   :  { %713 = vmatpush3.bf16.msra.mxu1 %v776_v7  ;;  %v792_v23 = vld [vmem:[#allocation5 + $0xa8] sm:$0xff]   ;;  %v793_v24 = vld [vmem:[#allocation5 + $0x70] sm:$0xff]   ;;  %v797_v28 = vld [vmem:[#allocation5 + $0x78] sm:$0xff]  }
  0x2f   :  { %714 = vmatprep.subr.bf16.mxu1 %v779_v10  ;;  %v794_v25 = vld [vmem:[#allocation5 + $0x30] sm:$0xff]   ;;  %v798_v29 = vld [vmem:[#allocation5 + $0x38] sm:$0xff]   ;;  %v42_v34 = vld [vmem:[#allocation2] sm:$0xff] }
  0x30   :  { %693 = vmatpush3.bf16.msra.mxu0 %v778_v9  ;;  %v795_v26 = vld [vmem:[#allocation5 + $0xf0] sm:$0xff]   ;;  %v799_v30 = vld [vmem:[#allocation5 + $0xf8] sm:$0xff]   ;;  %v49_v35 = vpack.c.bf16 %v42_v34, %v42_v34  ;;  %v801_v36 = vld [vmem:[#allocation5 + $0x140] sm:$0xff]  }
  0x31   :  { %694 = vmatprep.subr.bf16.mxu0 %v781_v12  ;;  %v796_v27 = vld [vmem:[#allocation5 + $0xb0] sm:$0xff]   ;;  %v800_v33 = vld [vmem:[#allocation5 + $0xb8] sm:$0xff]   ;;  %v45_v37 = vld [vmem:[#allocation2 + $0x18] sm:$0xff] }
  0x32   :  { %715 = vmatpush3.bf16.msra.mxu1 %v780_v11  ;;  %v43_v31 = vld [vmem:[#allocation2 + $0x8] sm:$0xff]  ;;  %v52_v38 = vpack.c.bf16 %v45_v37, %v45_v37  ;;  %v802_v39 = vld [vmem:[#allocation5 + $0x100] sm:$0xff]   ;;  %v44_v40 = vld [vmem:[#allocation2 + $0x10] sm:$0xff] }
  0x33   :  { %716 = vmatprep.subr.bf16.mxu1 %v783_v14  ;;  %v50_v32 = vpack.c.bf16 %v43_v31, %v43_v31  ;;  %v51_v41 = vpack.c.bf16 %v44_v40, %v44_v40  ;;  %v803_v42 = vld [vmem:[#allocation5 + $0x148] sm:$0xff]   ;;  %v805_v45 = vld [vmem:[#allocation5 + $0x150] sm:$0xff]   ;;  %v807_v47 = vld [vmem:[#allocation5 + $0x158] sm:$0xff]  }
  0x34   :  { %695 = vmatpush3.bf16.msra.mxu0 %v782_v13  ;;  %531 = vmatprep.mubr.bf16.mxu1 %v52_v38  ;;  %v804_v43 = vld [vmem:[#allocation5 + $0x108] sm:$0xff]   ;;  %v806_v46 = vld [vmem:[#allocation5 + $0x110] sm:$0xff]   ;;  %v808_v48 = vld [vmem:[#allocation5 + $0x118] sm:$0xff]  }
  0x35   :  { %696 = vmatprep.subr.bf16.mxu0 %v785_v16  ;;  %491 = vmatprep.mubr.bf16.mxu0 %v50_v32  ;;  %v809_v49 = vld [vmem:[#allocation5 + $0x160] sm:$0xff]   ;;  %v811_v51 = vld [vmem:[#allocation5 + $0x168] sm:$0xff]   ;;  %v47_v53 = vld [vmem:[#allocation2 + $0x28] sm:$0xff] }
  0x36   :  { %717 = vmatpush3.bf16.msra.mxu1 %v784_v15  ;;  %v810_v50 = vld [vmem:[#allocation5 + $0x120] sm:$0xff]   ;;  %v54_v54 = vpack.c.bf16 %v47_v53, %v47_v53  ;;  %v48_v55 = vld [vmem:[#allocation2 + $0x30] sm:$0xff]  ;;  %v812_v56 = vld [vmem:[#allocation5 + $0x128] sm:$0xff]  }
  0x37   :  { %718 = vmatprep.subr.bf16.mxu1 %v787_v18  ;;  %v817_v52 = vld [vmem:[#allocation5 + $0x180] sm:$0xff]   ;;  %v55_v57 = vpack.c.bf16 %v48_v55, %v48_v55  ;;  %v813_v58 = vld [vmem:[#allocation5 + $0x170] sm:$0xff]   ;;  %v815_v60 = vld [vmem:[#allocation5 + $0x178] sm:$0xff]  }
  0x38   :  { %697 = vmatpush3.bf16.msra.mxu0 %v786_v17  ;;  %v814_v59 = vld [vmem:[#allocation5 + $0x130] sm:$0xff]   ;;  %v816_v61 = vld [vmem:[#allocation5 + $0x138] sm:$0xff]   ;;  %v46_v62 = vld [vmem:[#allocation2 + $0x20] sm:$0xff] }
  0x39   :  { %698 = vmatprep.subr.bf16.mxu0 %v789_v20  ;;  %v53_v63 = vpack.c.bf16 %v46_v62, %v46_v62  ;;  %v637_v1 = vld [vmem:[%s965_s2] ss:$0 sm:$0xff]  ;;  %s896_s2 = smov [#allocation7]  }
  0x3a   :  { %719 = vmatpush3.bf16.msra.mxu1 %v788_v19  ;;  %s627_s11 = sshll.u32 %s896_s2, 4  ;;  %s628_s11 = int_to_ptr.vmem [resolvable:$true] %s627_s11 }
  0x3b   :  { %720 = vmatprep.subr.bf16.mxu1 %v791_v22  ;;  %s862_s12 = scalar_lea.vmem %s628_s11, 128  ;;  %p867_p3 = scmp.lt.s32.totalorder %s628_s11, %s628_s11 }
  0x3c   :  { %699 = vmatpush3.bf16.msra.mxu0 %v790_v21  ;;  %p863_p2 = scmp.ne.s32.totalorder %s628_s11, %s862_s12  ;;  %p868_p4 = scmp.lt.s32.totalorder %s862_s12, %s862_s12 }
  0x3d   :  { %700 = vmatprep.subr.bf16.mxu0 %v793_v24 }
  0x3e   :  { %721 = vmatpush3.bf16.msra.mxu1 %v792_v23  ;;  %p869_p5 = por %p868_p4, %p867_p3 }
  0x3f   :  { %722 = vmatprep.subr.bf16.mxu1 %v795_v26 }
  0x40   :  { %701 = vmatpush3.bf16.msra.mxu0 %v794_v25  ;;  %p870_p6 = pnand %p869_p5, %p863_p2 }
  0x41   :  { %702 = vmatprep.subr.bf16.mxu0 %v797_v28 }
  0x42   :  { %723 = vmatpush3.bf16.msra.mxu1 %v796_v27 }
  0x43   :  { %724 = vmatprep.subr.bf16.mxu1 %v799_v30 }
  0x44   :  { %703 = vmatpush3.bf16.msra.mxu0 %v798_v29 }
  0x45   :  { %732 = vmatprep.subr.bf16.mxu0 %v801_v36 }
  0x46   :  { %725 = vmatpush3.bf16.msra.mxu1 %v800_v33 }
  0x47   :  { %492 = vmatmul.mubr.bf16.vlgmr.msra.gmra.mrb[0].mxu0 %v49_v35  ;;  %756 = vmatprep.subr.bf16.mxu1 %v894_v44 }
  0x48   :  { %733 = vmatpush3.bf16.msra.mxu0 %v802_v39  ;;  %571 = vmatprep.mubr.bf16.mxu0 %v54_v54 }
  0x49   :  { %532 = vmatmul.mubr.bf16.vlgmr.msra.gmra.mrb[0].mxu1 %v51_v41  ;;  %734 = vmatprep.subr.bf16.mxu0 %v803_v42 }
  0x4a   :  { %758 = vmatprep.mubr.msk.bf16.mxu1 %vm895_vm0, %v894_v44  ;;  %757 = vmatpush3.bf16.msra.mxu1 %v817_v52 }
  0x4c   :  { %735 = vmatpush3.bf16.msra.mxu0 %v804_v43 }
  0x4d   :  { %736 = vmatprep.subr.bf16.mxu0 %v805_v45 }
  0x50   :  { %737 = vmatpush3.bf16.msra.mxu0 %v806_v46 }
  0x51   :  { %738 = vmatprep.subr.bf16.mxu0 %v807_v47  ;;  %759 = vmatmul.mubr.msk.bf16.vlgmr.msra.gmra.mrb[4].mxu1 %vm455_vm1, %v55_v57 }
  0x54   :  { %739 = vmatpush3.bf16.msra.mxu0 %v808_v48 }
  0x55   :  { %740 = vmatprep.subr.bf16.mxu0 %v809_v49 }
  0x58   :  { %741 = vmatpush3.bf16.msra.mxu0 %v810_v50 }
  0x59   :  { %742 = vmatprep.subr.bf16.mxu0 %v811_v51 }
  0x5c   :  { %743 = vmatpush3.bf16.msra.mxu0 %v812_v56 }
  0x5d   :  { %744 = vmatprep.subr.bf16.mxu0 %v813_v58 }
  0x60   :  { %745 = vmatpush3.bf16.msra.mxu0 %v814_v59 }
  0x61   :  { %746 = vmatprep.subr.bf16.mxu0 %v815_v60 }
  0x64   :  { %747 = vmatpush3.bf16.msra.mxu0 %v816_v61 }
  0x67   :  { %572 = vmatmul.mubr.bf16.vlgmr.msra.gmra.mrb[4].mxu0 %v53_v63 }
 0x11a   :  { %v704_v0 = vpop.f32.mrb[0].mxu0 }
 0x11b   :  { %v705_v2 = vpop.f32.mrb[1].mxu0 }
 0x11c   :  { %v706_v3 = vadd.f32 %v705_v2, %v704_v0  ;;  %v707_v4 = vpop.f32.mrb[2].mxu0  ;;  %v726_v5 = vpop.f32.mrb[0].mxu1 }
 0x11d   :  { %v708_v6 = vpop.f32.mrb[3].mxu0  ;;  %v727_v8 = vpop.f32.mrb[1].mxu1 }
 0x11e   :  { %v494_v7 = vadd.f32 %v706_v3, %v637_v1  ;;  %v728_v9 = vadd.f32 %v727_v8, %v726_v5  ;;  %v729_v10 = vpop.f32.mrb[2].mxu1 }
 0x11f   :  { %v730_v11 = vpop.f32.mrb[3].mxu1 }
 0x120   :  { %v534_v12 = vadd.f32 %v728_v9, %v494_v7 }
 0x124   :  { %v613_v13 = vpop.f32.mrb[4].mxu1 }
 0x125   :  { %v760_v14 = vpop.f32.mrb[5].mxu1 }
 0x126   :  { %v616_v15 = vpop.f32.mrb[6].mxu1 }
 0x127   :  { %v761_v16 = vpop.f32.mrb[7].mxu1 }
 0x13a   :  { %v748_v17 = vpop.f32.mrb[4].mxu0 }
 0x13b   :  { %v749_v18 = vpop.f32.mrb[5].mxu0 }
 0x13c   :  { %v750_v19 = vadd.f32 %v749_v18, %v748_v17  ;;  %v751_v20 = vpop.f32.mrb[6].mxu0 }
 0x13d   :  { %v752_v21 = vpop.f32.mrb[7].mxu0 }
 0x13e   :  { %v574_v22 = vadd.f32 %v750_v19, %v534_v12 }
 0x140   :  { %v614_v23 = vadd.f32 %v613_v13, %v574_v22 }
 0x142   :  { %620 = vst.msk [vmem:[#allocation7] sm:$0xff] %vm619_vm2, %v614_v23 }
 0x143   :  { %873 = shalt.err (!%p870_p6)
}
 0x144   :  { %s874_s15 = scalar_lea.hbm %s966_s3, 128 }
 0x145   :  { %p875_p7 = scmp.ne.s32.totalorder %s966_s3, %s874_s15  ;;  %p878_p8 = scmp.lt.u32.totalorder %s874_s15, %s966_s3 }
 0x147   :  { %p880_p9 = pnand %p878_p8, %p875_p7 }
 0x149   :  { %883 = shalt.err (!%p880_p9)
}
 0x14a   :  { %630 = dma.vmem_to_hbm [thread:$0]  %s628_s11, 128, %s966_s3, [#allocation4]  }
 0x14b   :  { %888 = dma.done.wait [#allocation4], 128  }
 0x14c   :  { %889 = vsyncadd [#allocation4], 4294967168 }
 0x14d   :  { %634 = vsyncpa [#allocation3], 1 }
 0x14e   :  { %635 = vsyncpa [#allocation6], 1 }
 0x14f   :  { %636 = vsyncpa [#allocation4], 1 }

</bundles_post_ra>
